<compile_context>
chip_gen: v7x
topology: tpu7x:2x2x1
jax: 0.10.0
libtpu: 0.0.40
codegen_flags: <defaults>
</compile_context>

<pallas_src>
import jax
import jax.numpy as jnp
from jax.experimental import pallas as pl
from jax.experimental.pallas import tpu as pltpu

_LANE = 128
_SUBLANE = 8
_TILE_QUANTUM = _LANE * _SUBLANE  # 1024 spatial elements: keeps (8,128) divisibility


def _outconv_kernel(w_ref, b_ref, x_ref, o_ref):
    """1x1 conv on one (C_in, S, 128) spatial slab.

    w_ref: (C_out, C_in) f32 in SMEM  (read as scalars)
    b_ref: (C_out,)      f32 in SMEM
    x_ref: (C_in, S, 128)  in VMEM    (sublane- and lane-dense)
    o_ref: (C_out, S, 128) in VMEM
    """
    c_out, c_in = w_ref.shape
    x = x_ref[...].astype(jnp.float32)            # load once, accumulate in f32
    for co in range(c_out):                       # unrolled: C_out is tiny/static
        acc = x[0] * w_ref[co, 0]                 # scalar-broadcast VPU multiply
        for ci in range(1, c_in):                 # unrolled: C_in is tiny/static
            acc = acc + x[ci] * w_ref[co, ci]
        # bias add + single dense (S, 128) store per output channel
        o_ref[co] = (acc + b_ref[co]).astype(o_ref.dtype)


def outconv_pallas(x_nchw, weight, bias, *,
                   max_spatial_tile=65536, vmem_budget_bytes=12 << 20):
    """1x1 conv, equivalent to nn.Conv2d(C_in, C_out, kernel_size=1).

    x_nchw: (N, C_in, H, W)
    weight: (C_out, C_in, 1, 1)   (PyTorch conv weight layout)
    bias:   (C_out,)
    returns (N, C_out, H, W)
    """
    N, C_in, H, W = x_nchw.shape
    C_out = weight.shape[0]
    HW = H * W

    w_mat = weight.reshape(C_out, C_in).astype(jnp.float32)
    b_vec = bias.reshape(C_out).astype(jnp.float32)

    # Free layout glue: merge trailing spatial dims of contiguous NCHW.
    x3 = x_nchw.reshape(N, C_in, HW)

    # Pad the spatial axis to a lane multiple so every row is lane-dense.
    hw_lane = pl.cdiv(HW, _LANE) * _LANE

    # Spatial tile: as large as the VMEM budget allows (mem-bound kernel ->
    # amortize per-grid-step overhead), quantized to 8*128 so the block's
    # (sublane, lane) dims satisfy the (8, 128) divisibility rule.
    bytes_per_spatial = (C_in + C_out) * 4 * 2          # f32, double-buffered in+out
    t_cap = max(_TILE_QUANTUM, vmem_budget_bytes // bytes_per_spatial)
    t_cap = min(max_spatial_tile, t_cap)

    if hw_lane <= t_cap:
        tile = hw_lane                                  # single full-extent block
    else:
        tile = (t_cap // _TILE_QUANTUM) * _TILE_QUANTUM

    hw_pad = pl.cdiv(hw_lane, tile) * tile
    if hw_pad != HW:
        x3 = jnp.pad(x3, ((0, 0), (0, 0), (0, hw_pad - HW)))

    # View spatial as (sublane, lane) so the kernel works on packed vregs.
    s_total = hw_pad // _LANE
    s_tile = tile // _LANE
    x4 = x3.reshape(N, C_in, s_total, _LANE)

    grid = (N, hw_pad // tile)

    out4 = pl.pallas_call(
        _outconv_kernel,
        out_shape=jax.ShapeDtypeStruct((N, C_out, s_total, _LANE), x_nchw.dtype),
        grid_spec=pltpu.PrefetchScalarGridSpec(
            num_scalar_prefetch=0,
            grid=grid,
            in_specs=[
                # Tiny weight / bias live in SMEM; read as scalars in-kernel.
                pl.BlockSpec(memory_space=pltpu.MemorySpace.SMEM),
                pl.BlockSpec(memory_space=pltpu.MemorySpace.SMEM),
                # x tile: (C_in, s_tile, 128), batch dim squeezed out.
                pl.BlockSpec((None, C_in, s_tile, _LANE),
                             lambda n, s: (n, 0, s, 0)),
            ],
            out_specs=pl.BlockSpec((None, C_out, s_tile, _LANE),
                                   lambda n, s: (n, 0, s, 0)),
        ),
        compiler_params=pltpu.CompilerParams(
            dimension_semantics=("parallel", "parallel"),
        ),
    )(w_mat, b_vec, x4)

    out3 = out4.reshape(N, C_out, hw_pad)
    if hw_pad != HW:
        out3 = out3[:, :, :HW]
    return out3.reshape(N, C_out, H, W)


def outconv_reference(x_nchw, weight, bias):
    # Pure-JAX reference of the same 1x1 conv for a correctness check.
    w_mat = weight.reshape(weight.shape[0], weight.shape[1])  # (C_out, C_in)
    return jnp.einsum("nchw,oc->nohw", x_nchw, w_mat) + bias[None, :, None, None]


if __name__ == "__main__":
    key = jax.random.PRNGKey(0)
    kx, kw, kb = jax.random.split(key, 3)

    N, C_in, C_out, H, W = 2, 4, 3, 16, 16

    x = jax.random.normal(kx, (N, C_in, H, W), dtype=jnp.float32)
    # Deterministic synthetic parameters (matches Conv2d(in, out, k=1) shapes).
    weight = jax.random.normal(kw, (C_out, C_in, 1, 1), dtype=jnp.float32) * 0.1
    bias = jax.random.normal(kb, (C_out,), dtype=jnp.float32) * 0.1

    out = outconv_pallas(x, weight, bias)
    out = jax.block_until_ready(out)

    ref = outconv_reference(x, weight, bias)
    assert out.shape == (N, C_out, H, W)
    assert jnp.allclose(out, ref, atol=1e-5, rtol=1e-5)

    print("KERNEL_OK")
</pallas_src>

<mosaic_0001>
module attributes {stable_mosaic.version = 11 : i64} {
  func.func @_outconv_kernel(%arg0: i32, %arg1: i32, %arg2: memref<3x4xf32, #tpu.memory_space<smem>>, %arg3: memref<3xf32, #tpu.memory_space<smem>>, %arg4: memref<1x4x2x128xf32, #tpu.memory_space<vmem>>, %arg5: memref<1x3x2x128xf32, #tpu.memory_space<vmem>>) attributes {dimension_semantics = [#tpu.dimension_semantics<parallel>, #tpu.dimension_semantics<parallel>], iteration_bounds = array<i64: 2, 1>, scalar_prefetch = 0 : i64, scratch_operands = 0 : i64, tpu.core_type = #tpu.core_type<tc>, window_params = [{transform_indices = @transform_0, window_bounds = array<i64: 3, 4>}, {transform_indices = @transform_1, window_bounds = array<i64: 3>}, {transform_indices = @transform_2, window_bounds = array<i64: 1, 4, 2, 128>}, {transform_indices = @transform_3, window_bounds = array<i64: 1, 3, 2, 128>}]} {
    %c0 = arith.constant 0 : index
    %c0_0 = arith.constant 0 : index
    %c0_1 = arith.constant 0 : index
    %c0_2 = arith.constant 0 : index
    %0 = vector.load %arg4[%c0, %c0_0, %c0_1, %c0_2] : memref<1x4x2x128xf32, #tpu.memory_space<vmem>>, vector<1x4x2x128xf32>
    %1 = vector.shape_cast %0 : vector<1x4x2x128xf32> to vector<4x2x128xf32>
    %2 = vector.extract_strided_slice %1 {offsets = [0, 0, 0], sizes = [1, 2, 128], strides = [1, 1, 1]} : vector<4x2x128xf32> to vector<1x2x128xf32>
    %3 = vector.shape_cast %2 : vector<1x2x128xf32> to vector<2x128xf32>
    %c0_3 = arith.constant 0 : index
    %c0_4 = arith.constant 0 : index
    %4 = memref.load %arg2[%c0_3, %c0_4] : memref<3x4xf32, #tpu.memory_space<smem>>
    %5 = vector.broadcast %4 : f32 to vector<2x128xf32>
    %6 = arith.mulf %3, %5 : vector<2x128xf32>
    %7 = vector.extract_strided_slice %1 {offsets = [1, 0, 0], sizes = [1, 2, 128], strides = [1, 1, 1]} : vector<4x2x128xf32> to vector<1x2x128xf32>
    %8 = vector.shape_cast %7 : vector<1x2x128xf32> to vector<2x128xf32>
    %c0_5 = arith.constant 0 : index
    %c1 = arith.constant 1 : index
    %9 = memref.load %arg2[%c0_5, %c1] : memref<3x4xf32, #tpu.memory_space<smem>>
    %10 = vector.broadcast %9 : f32 to vector<2x128xf32>
    %11 = arith.mulf %8, %10 : vector<2x128xf32>
    %12 = arith.addf %6, %11 : vector<2x128xf32>
    %13 = vector.extract_strided_slice %1 {offsets = [2, 0, 0], sizes = [1, 2, 128], strides = [1, 1, 1]} : vector<4x2x128xf32> to vector<1x2x128xf32>
    %14 = vector.shape_cast %13 : vector<1x2x128xf32> to vector<2x128xf32>
    %c0_6 = arith.constant 0 : index
    %c2 = arith.constant 2 : index
    %15 = memref.load %arg2[%c0_6, %c2] : memref<3x4xf32, #tpu.memory_space<smem>>
    %16 = vector.broadcast %15 : f32 to vector<2x128xf32>
    %17 = arith.mulf %14, %16 : vector<2x128xf32>
    %18 = arith.addf %12, %17 : vector<2x128xf32>
    %19 = vector.extract_strided_slice %1 {offsets = [3, 0, 0], sizes = [1, 2, 128], strides = [1, 1, 1]} : vector<4x2x128xf32> to vector<1x2x128xf32>
    %20 = vector.shape_cast %19 : vector<1x2x128xf32> to vector<2x128xf32>
    %c0_7 = arith.constant 0 : index
    %c3 = arith.constant 3 : index
    %21 = memref.load %arg2[%c0_7, %c3] : memref<3x4xf32, #tpu.memory_space<smem>>
    %22 = vector.broadcast %21 : f32 to vector<2x128xf32>
    %23 = arith.mulf %20, %22 : vector<2x128xf32>
    %24 = arith.addf %18, %23 : vector<2x128xf32>
    %c0_8 = arith.constant 0 : index
    %25 = memref.load %arg3[%c0_8] : memref<3xf32, #tpu.memory_space<smem>>
    %26 = vector.broadcast %25 : f32 to vector<2x128xf32>
    %27 = arith.addf %24, %26 : vector<2x128xf32>
    %c0_9 = arith.constant 0 : index
    %c0_10 = arith.constant 0 : index
    %c0_11 = arith.constant 0 : index
    %c0_12 = arith.constant 0 : index
    %28 = vector.load %arg5[%c0_9, %c0_10, %c0_11, %c0_12] : memref<1x3x2x128xf32, #tpu.memory_space<vmem>>, vector<1x1x2x128xf32>
    %29 = vector.shape_cast %28 : vector<1x1x2x128xf32> to vector<2x128xf32>
    %30 = vector.shape_cast %27 : vector<2x128xf32> to vector<1x1x2x128xf32>
    tpu.vector_store %arg5[%c0_9, %c0_10, %c0_11, %c0_12], %30 {strides = array<i32>} : memref<1x3x2x128xf32, #tpu.memory_space<vmem>>, vector<1x1x2x128xf32>,
    %31 = vector.extract_strided_slice %1 {offsets = [0, 0, 0], sizes = [1, 2, 128], strides = [1, 1, 1]} : vector<4x2x128xf32> to vector<1x2x128xf32>
    %32 = vector.shape_cast %31 : vector<1x2x128xf32> to vector<2x128xf32>
    %c1_13 = arith.constant 1 : index
    %c0_14 = arith.constant 0 : index
    %33 = memref.load %arg2[%c1_13, %c0_14] : memref<3x4xf32, #tpu.memory_space<smem>>
    %34 = vector.broadcast %33 : f32 to vector<2x128xf32>
    %35 = arith.mulf %32, %34 : vector<2x128xf32>
    %36 = vector.extract_strided_slice %1 {offsets = [1, 0, 0], sizes = [1, 2, 128], strides = [1, 1, 1]} : vector<4x2x128xf32> to vector<1x2x128xf32>
    %37 = vector.shape_cast %36 : vector<1x2x128xf32> to vector<2x128xf32>
    %c1_15 = arith.constant 1 : index
    %c1_16 = arith.constant 1 : index
    %38 = memref.load %arg2[%c1_15, %c1_16] : memref<3x4xf32, #tpu.memory_space<smem>>
    %39 = vector.broadcast %38 : f32 to vector<2x128xf32>
    %40 = arith.mulf %37, %39 : vector<2x128xf32>
    %41 = arith.addf %35, %40 : vector<2x128xf32>
    %42 = vector.extract_strided_slice %1 {offsets = [2, 0, 0], sizes = [1, 2, 128], strides = [1, 1, 1]} : vector<4x2x128xf32> to vector<1x2x128xf32>
    %43 = vector.shape_cast %42 : vector<1x2x128xf32> to vector<2x128xf32>
    %c1_17 = arith.constant 1 : index
    %c2_18 = arith.constant 2 : index
    %44 = memref.load %arg2[%c1_17, %c2_18] : memref<3x4xf32, #tpu.memory_space<smem>>
    %45 = vector.broadcast %44 : f32 to vector<2x128xf32>
    %46 = arith.mulf %43, %45 : vector<2x128xf32>
    %47 = arith.addf %41, %46 : vector<2x128xf32>
    %48 = vector.extract_strided_slice %1 {offsets = [3, 0, 0], sizes = [1, 2, 128], strides = [1, 1, 1]} : vector<4x2x128xf32> to vector<1x2x128xf32>
    %49 = vector.shape_cast %48 : vector<1x2x128xf32> to vector<2x128xf32>
    %c1_19 = arith.constant 1 : index
    %c3_20 = arith.constant 3 : index
    %50 = memref.load %arg2[%c1_19, %c3_20] : memref<3x4xf32, #tpu.memory_space<smem>>
    %51 = vector.broadcast %50 : f32 to vector<2x128xf32>
    %52 = arith.mulf %49, %51 : vector<2x128xf32>
    %53 = arith.addf %47, %52 : vector<2x128xf32>
    %c1_21 = arith.constant 1 : index
    %54 = memref.load %arg3[%c1_21] : memref<3xf32, #tpu.memory_space<smem>>
    %55 = vector.broadcast %54 : f32 to vector<2x128xf32>
    %56 = arith.addf %53, %55 : vector<2x128xf32>
    %c0_22 = arith.constant 0 : index
    %c1_23 = arith.constant 1 : index
    %c0_24 = arith.constant 0 : index
    %c0_25 = arith.constant 0 : index
    %57 = vector.load %arg5[%c0_22, %c1_23, %c0_24, %c0_25] : memref<1x3x2x128xf32, #tpu.memory_space<vmem>>, vector<1x1x2x128xf32>
    %58 = vector.shape_cast %57 : vector<1x1x2x128xf32> to vector<2x128xf32>
    %59 = vector.shape_cast %56 : vector<2x128xf32> to vector<1x1x2x128xf32>
    tpu.vector_store %arg5[%c0_22, %c1_23, %c0_24, %c0_25], %59 {strides = array<i32>} : memref<1x3x2x128xf32, #tpu.memory_space<vmem>>, vector<1x1x2x128xf32>,
    %60 = vector.extract_strided_slice %1 {offsets = [0, 0, 0], sizes = [1, 2, 128], strides = [1, 1, 1]} : vector<4x2x128xf32> to vector<1x2x128xf32>
    %61 = vector.shape_cast %60 : vector<1x2x128xf32> to vector<2x128xf32>
    %c2_26 = arith.constant 2 : index
    %c0_27 = arith.constant 0 : index
    %62 = memref.load %arg2[%c2_26, %c0_27] : memref<3x4xf32, #tpu.memory_space<smem>>
    %63 = vector.broadcast %62 : f32 to vector<2x128xf32>
    %64 = arith.mulf %61, %63 : vector<2x128xf32>
    %65 = vector.extract_strided_slice %1 {offsets = [1, 0, 0], sizes = [1, 2, 128], strides = [1, 1, 1]} : vector<4x2x128xf32> to vector<1x2x128xf32>
    %66 = vector.shape_cast %65 : vector<1x2x128xf32> to vector<2x128xf32>
    %c2_28 = arith.constant 2 : index
    %c1_29 = arith.constant 1 : index
    %67 = memref.load %arg2[%c2_28, %c1_29] : memref<3x4xf32, #tpu.memory_space<smem>>
    %68 = vector.broadcast %67 : f32 to vector<2x128xf32>
    %69 = arith.mulf %66, %68 : vector<2x128xf32>
    %70 = arith.addf %64, %69 : vector<2x128xf32>
    %71 = vector.extract_strided_slice %1 {offsets = [2, 0, 0], sizes = [1, 2, 128], strides = [1, 1, 1]} : vector<4x2x128xf32> to vector<1x2x128xf32>
    %72 = vector.shape_cast %71 : vector<1x2x128xf32> to vector<2x128xf32>
    %c2_30 = arith.constant 2 : index
    %c2_31 = arith.constant 2 : index
    %73 = memref.load %arg2[%c2_30, %c2_31] : memref<3x4xf32, #tpu.memory_space<smem>>
    %74 = vector.broadcast %73 : f32 to vector<2x128xf32>
    %75 = arith.mulf %72, %74 : vector<2x128xf32>
    %76 = arith.addf %70, %75 : vector<2x128xf32>
    %77 = vector.extract_strided_slice %1 {offsets = [3, 0, 0], sizes = [1, 2, 128], strides = [1, 1, 1]} : vector<4x2x128xf32> to vector<1x2x128xf32>
    %78 = vector.shape_cast %77 : vector<1x2x128xf32> to vector<2x128xf32>
    %c2_32 = arith.constant 2 : index
    %c3_33 = arith.constant 3 : index
    %79 = memref.load %arg2[%c2_32, %c3_33] : memref<3x4xf32, #tpu.memory_space<smem>>
    %80 = vector.broadcast %79 : f32 to vector<2x128xf32>
    %81 = arith.mulf %78, %80 : vector<2x128xf32>
    %82 = arith.addf %76, %81 : vector<2x128xf32>
    %c2_34 = arith.constant 2 : index
    %83 = memref.load %arg3[%c2_34] : memref<3xf32, #tpu.memory_space<smem>>
    %84 = vector.broadcast %83 : f32 to vector<2x128xf32>
    %85 = arith.addf %82, %84 : vector<2x128xf32>
    %c0_35 = arith.constant 0 : index
    %c2_36 = arith.constant 2 : index
    %c0_37 = arith.constant 0 : index
    %c0_38 = arith.constant 0 : index
    %86 = vector.load %arg5[%c0_35, %c2_36, %c0_37, %c0_38] : memref<1x3x2x128xf32, #tpu.memory_space<vmem>>, vector<1x1x2x128xf32>
    %87 = vector.shape_cast %86 : vector<1x1x2x128xf32> to vector<2x128xf32>
    %88 = vector.shape_cast %85 : vector<2x128xf32> to vector<1x1x2x128xf32>
    tpu.vector_store %arg5[%c0_35, %c2_36, %c0_37, %c0_38], %88 {strides = array<i32>} : memref<1x3x2x128xf32, #tpu.memory_space<vmem>>, vector<1x1x2x128xf32>,
    return
  }
  func.func @transform_0(%arg0: i32, %arg1: i32) -> (i32, i32) {
    %c0_i32 = arith.constant 0 : i32
    %c0_i32_0 = arith.constant 0 : i32
    %c0_i32_1 = arith.constant 0 : i32
    return %c0_i32, %c0_i32_0 : i32, i32
  }
  func.func @transform_1(%arg0: i32, %arg1: i32) -> i32 {
    %c0_i32 = arith.constant 0 : i32
    %c0_i32_0 = arith.constant 0 : i32
    return %c0_i32 : i32
  }
  func.func @transform_2(%arg0: i32, %arg1: i32) -> (i32, i32, i32, i32) {
    %c0_i32 = arith.constant 0 : i32
    %c0_i32_0 = arith.constant 0 : i32
    %c0_i32_1 = arith.constant 0 : i32
    return %arg0, %c0_i32, %arg1, %c0_i32_0 : i32, i32, i32, i32
  }
  func.func @transform_3(%arg0: i32, %arg1: i32) -> (i32, i32, i32, i32) {
    %c0_i32 = arith.constant 0 : i32
    %c0_i32_0 = arith.constant 0 : i32
    %c0_i32_1 = arith.constant 0 : i32
    return %arg0, %c0_i32, %arg1, %c0_i32_0 : i32, i32, i32, i32
  }
}

</mosaic_0001>

<bundles_post_ra>
// kernel: tpu_custom_call.1
= control target key start
LH: loop header
LB: loop body
LE: loop exit
PB: predicated region body
PF: predicated region fallthrough
CT: control target
= control target key end

     0   :  { %8 = vsyncpa [#allocation5], 0  ;;  %s952_s0 = inlined_call_operand.hbm [shape: f32[3,4], index: 0, kind: input, shape index: {}]   ;;  %s953_s1 = inlined_call_operand.vmem [shape: f32[3], index: 1, kind: input, shape index: {}]   ;;  %s954_s2 = inlined_call_operand.hbm [shape: f32[2,4,2,128], index: 2, kind: input, shape index: {}]   ;;  %s955_s3 = inlined_call_operand.hbm [shape: f32[2,3,2,128], index: 3, kind: output, shape index: {}]  }
   0x1   :  { %9 = vsyncpa [#allocation6], 0 }
   0x2   :  { %10 = vsyncpa [#allocation3], 0 }
   0x3   :  { %12 = vsyncpa [#allocation3 + $0x1], 0 }
   0x4   :  { %13 = vsyncpa [#allocation4], 0 }
   0x5   :  { %15 = vsyncpa [#allocation4 + $0x1], 0  ;;  %s717_s12 = smov 0   ;;  %s719_s13 = smov 0  }
   0x6   :  { %s721_s14 = smov 0   ;;  %s723_s15 = smov 0  }
   0x7   :  { %s725_s16 = smov 0   ;;  %s727_s17 = smov 0  }
   0x8 LB: > { %s418_s18 = sadd.s32 4294967295, %s687_s17   ;;  %s419_s19 = sadd.s32 4294967294, %s687_s17   ;;  %s687_s17 = sphi %s727_s17, %s21_s17   ;;  %s683_s16 = sphi %s725_s16, %s976_s16   ;;  %s679_s15 = sphi %s723_s15, %s975_s15   ;;  %s675_s14 = sphi %s721_s14, %s974_s14   ;;  %s671_s13 = sphi %s719_s13, %s973_s13   ;;  %s667_s12 = sphi %s717_s12, %s972_s12  }
   0x9   : > { %s84_s20 = sadd.s32 1, %s675_s14  ;;  %p91_p0 = scmp.ne.s32.totalorder %s675_s14, %s671_s13 }
   0xa   : > { %p92_p1 = scmp.eq.s32.totalorder %s687_s17, 0  ;;  %p97_p2 = scmp.ne.s32.totalorder %s671_s13, %s667_s12 }
   0xb   : > { %p755_p3 = scmp.eq.s32.totalorder %s418_s18, 0  ;;  %p123_p4 = scmp.eq.s32.totalorder %s418_s18, 1 }
   0xc   : > { %p93_p5 = por %p92_p1, %p91_p0  ;;  %p129_p6 = scmp.eq.s32.totalorder %s419_s19, 1 }
   0xd   : > { %s960_s21 = scalar_select %p755_p3, 1, 0 }
   0xe   : > { %p761_p7 = por %p755_p3, %p97_p2  ;;  %p765_p8 = por %p123_p4, %p91_p0 }
   0xf   : > { %p769_p9 = por %p129_p6, %p97_p2  ;;  %p420_p10 = scmp.ge.s32.totalorder %s687_s17, 1 }
  0x10   : > { %s961_s22 = scalar_select %p761_p7, 1, 0 }
  0x11   : > { %s962_s23 = scalar_select %p765_p8, 1, 0 }
  0x12   : > { %s963_s24 = scalar_select %p769_p9, 1, 0 }
  0x13   : > { %p136_p11 = scmp.lt.s32.totalorder %s687_s17, 3  ;;  %p481_p1 = scmp.lt.s32.totalorder %s687_s17, 2 }
  0x14   : > { %s158_s28 = sshll.u32 %s953_s1, 4  ;;  %s169_s4 = sand.u32 1, %s675_s14   ;;  %s159_s28 = int_to_ptr.vmem [resolvable:$true] %s158_s28 }
  0x15   : > { %p776_p13 = pnand %p420_p10, %p136_p11  ;;  %p786_p4 = pnand %p481_p1, %p93_p5 }
  0x16   : > { %s33_s5 = sadd.s32 1, %s683_s16  ;;  %s539_s8 = scalar_lea.hbm %s952_s0, 64 }
  0x17   : > { %p464_p0 = pneg %p776_p13  ;;  %p540_p5 = scmp.ne.s32.totalorder %s952_s0, %s539_s8 }
  0x18   : > { %p546_p1 = scmp.lt.u32.totalorder %s539_s8, %s952_s0 }
  0x19   : > { %p792_p2 = pnand %p464_p0, %p755_p3 }
  0x1b   : > { %p541_p6 = pneg %p792_p2 }
  0x1d   : > { %p542_p10 = pnand %p541_p6, %p540_p5 }
  0x1f   : > { %p543_p11 = pneg %p542_p10 }
  0x21   : > { %p548_p0 = pnand %p546_p1, %p543_p11 }
  0x23   : > { %551 = shalt.err (!%p548_p0)
}
  0x24   : > { %s689_s19 = smov [#allocation2]   ;;  %s552_s6 = scalar_lea.vmem %s159_s28, 16 }
  0x25   : > { %467 = dma.hbm_to_smem (!%p792_p2), %s952_s0, 64, %s689_s19, [#allocation5]  }
  0x26   : > { %p553_p12 = scmp.ne.s32.totalorder %s159_s28, %s552_s6  ;;  %p560_p7 = scmp.lt.s32.totalorder %s159_s28, %s159_s28 }
  0x27   : > { %p561_p5 = scmp.lt.s32.totalorder %s552_s6, %s552_s6 }
  0x28   : > { %p555_p9 = pnand %p553_p12, %p541_p6 }
  0x29   : > { %p562_p10 = por %p561_p5, %p560_p7 }
  0x2a   : > { %p556_p8 = pneg %p555_p9 }
  0x2c   : > { %p563_p3 = pnand %p562_p10, %p556_p8 }
  0x2e   : > { %566 = shalt.err (!%p563_p3)
}
  0x2f   : > { %s690_s7 = smov [#allocation7]   ;;  %p35_p11 = scmp.ge.s32.totalorder %s33_s5, 2 }
  0x30   : > { %470 = dma.vmem_to_smem (!%p792_p2), %s159_s28, 16, %s690_s7, [#allocation6]  }
  0x31   : > { %s424_s8 = sshll.u32 %s169_s4, 3  ;;  %s449_s9 = sshll.u32 %s683_s16, 7 }
  0x32   : > { %s978_s5 = smov (%p35_p11, %s33_s5), 0  ;;  %s824_s30 = scalar_lea.hbm %s954_s2, %s449_s9 }
  0x33   : > { %s79_s18 = ssub.s32 %s683_s16, %s978_s5  ;;  %s173_s19 = scalar_lea.vmem [#allocation8], %s424_s8 }
  0x34   : > { %s181_s28 = sshll.u32 %s173_s19, 4  ;;  %p82_p3 = scmp.eq.s32.totalorder %s79_s18, 0  ;;  %s828_s28 = int_to_ptr.vmem [resolvable:$true] %s181_s28 }
  0x35   : > { %s837_s27 = scalar_lea.sflag [#allocation3], %s169_s4  ;;  %s567_s6 = scalar_lea.hbm %s824_s30, 128 }
  0x36   : > { %s833_s26 = scalar_select %p82_p3, %s675_s14, %s84_s20  }
  0x37   : > { %p568_p7 = scmp.ne.s32.totalorder %s824_s30, %s567_s6  ;;  %p569_p8 = pneg %p786_p4 }
  0x38   : > { %s572_s9 = scalar_lea.hbm %s954_s2, 256  ;;  %p573_p2 = scmp.lt.u32.totalorder %s824_s30, %s954_s2 }
  0x39   : > { %p570_p9 = pnand %p569_p8, %p568_p7  ;;  %p574_p6 = scmp.lt.u32.totalorder %s572_s9, %s567_s6 }
  0x3a   : > { %p576_p0 = scmp.lt.u32.totalorder %s567_s6, %s824_s30 }
  0x3b   : > { %p571_p12 = pneg %p570_p9  ;;  %p575_p1 = por %p574_p6, %p573_p2 }
  0x3d   : > { %p577_p5 = por %p576_p0, %p575_p1 }
  0x3f   : > { %p578_p10 = pnand %p577_p5, %p571_p12 }
  0x41   : > { %581 = shalt.err (!%p578_p10)
}
  0x42   : > { %s582_s20 = scalar_lea.vmem %s828_s28, 128  ;;  %s691_s4 = smov [#allocation8]  }
  0x43   : > { %p583_p11 = scmp.ne.s32.totalorder %s828_s28, %s582_s20  ;;  %s587_s18 = sshll.u32 %s691_s4, 4  ;;  %s588_s18 = int_to_ptr.vmem [resolvable:$false] %s587_s18 }
  0x44   : > { %s589_s19 = scalar_lea.vmem %s588_s18, 256  ;;  %p590_p9 = scmp.lt.s32.totalorder %s828_s28, %s588_s18 }
  0x45   : > { %p585_p3 = pnand %p583_p11, %p569_p8  ;;  %p591_p2 = scmp.lt.s32.totalorder %s589_s19, %s582_s20 }
  0x47   : > { %p586_p7 = pneg %p585_p3  ;;  %p592_p6 = por %p591_p2, %p590_p9 }
  0x49   : > { %p593_p1 = pnand %p592_p6, %p586_p7 }
  0x4b   : > { %596 = shalt.err (!%p593_p1)
}
  0x4c   : > { %s692_s6 = smov 32   ;;  %s693_s7 = smov 2  }
  0x4d   : > { %474 = dma.hbm_to_vmem [thread:$0]  (!%p786_p4), %s824_s30, 128, %s828_s28, %s837_s27, %s692_s6, %s692_s6, %s693_s7  }
  0x4e   : > { %193 = sbr.rel (%p776_p13) target bundleno = 131 (0x83), region = 32  ;;  %p967_p8 = scmp.ne.s32.totalorder (!%p776_p13), %s960_s21, 0 }
  0x55   : > { %650 = dma.done.wait (%p967_p8), [#allocation5], 64  }
  0x56   : > { %652 = vsyncadd (%p967_p8), [#allocation5], 4294967232 }
  0x57   : > { %654 = dma.done.wait (%p967_p8), [#allocation6], 16  }
  0x58   : > { %656 = vsyncadd (%p967_p8), [#allocation6], 4294967280  ;;  %s876_s8 = sand.u32 1, %s671_s13   ;;  %p968_p13 = scmp.ne.s32.totalorder %s961_s22, 0 }
  0x59   : > { %s430_s25 = sshll.u32 %s876_s8, 3  ;;  %s204_s29 = scalar_lea.sflag [#allocation3], %s876_s8 }
  0x5a   : > { %s207_s30 = scalar_lea.vmem [#allocation8], %s430_s25 }
  0x5b   : > { %658 = dma.done.wait (%p968_p13), %s204_s29, 128  }
  0x5c   : > { %660 = vsyncadd (%p968_p13), %s204_s29, 4294967168 }
  0x5d   : > { %212 = sfence }
  0x5e   : > { %s235_s28 = sld [smem:[#allocation2]]  ;;  %s431_s27 = sld [smem:[#allocation2 + $0x1]]  ;;  %v231_v0 = vld [vmem:[%s207_s30] sm:$0x3]  ;;  %v232_v1 = vld [vmem:[%s207_s30 + $0x2] sm:$0x3] }
  0x5f   : > { %s432_s9 = sld [smem:[#allocation2 + $0x2]]  ;;  %s433_s21 = sld [smem:[#allocation2 + $0x3]]  ;;  %v233_v2 = vld [vmem:[%s207_s30 + $0x4] sm:$0x3]  ;;  %v234_v4 = vld [vmem:[%s207_s30 + $0x6] sm:$0x3] }
  0x60   : > { %s884_s10 = sld [smem:[#allocation7]]  ;;  %s435_s20 = sld [smem:[#allocation2 + $0x81]] }
  0x61   : > { %s434_s11 = sld [smem:[#allocation2 + $0x80]]  ;;  %s436_s4 = sld [smem:[#allocation2 + $0x82]] }
  0x62   : > { %s437_s18 = sld [smem:[#allocation2 + $0x83]]  ;;  %s440_s22 = sld [smem:[#allocation2 + $0x100]] }
  0x63   : > { %s441_s19 = sld [smem:[#allocation2 + $0x101]]  ;;  %s442_s6 = sld [smem:[#allocation2 + $0x102]] }
  0x64   : > { %v236_v3 = vstv %s235_s28  ;;  %v239_v6 = vstv %s431_s27  ;;  %s886_s7 = sld [smem:[#allocation2 + $0x103]]  ;;  %s888_s25 = sld [smem:[#allocation7 + $0x1]] }
  0x65   : > { %v237_v5 = vmul.f32 %v236_v3, %v231_v0  ;;  %v240_v7 = vmul.f32 %v239_v6, %v232_v1  ;;  %v243_v8 = vstv %s432_s9  ;;  %v247_v9 = vstv %s433_s21  ;;  %s450_s29 = smul.u32 6, %s876_s8  ;;  %s891_s30 = sld [smem:[#allocation7 + $0x2]] }
  0x66   : > { %v244_v10 = vmul.f32 %v243_v8, %v233_v2  ;;  %v248_v12 = vmul.f32 %v247_v9, %v234_v4  ;;  %v258_v15 = vstv %s435_s20  ;;  %v251_v21 = vstv %s884_s10  ;;  %s451_s9 = smul.u32 96, %s679_s15  ;;  %s295_s20 = scalar_lea.sflag [#allocation4], %s876_s8 }
  0x67   : > { %v241_v11 = vadd.f32 %v240_v7, %v237_v5  ;;  %v255_v13 = vstv %s434_s11  ;;  %v262_v16 = vstv %s436_s4  ;;  %v259_v18 = vmul.f32 %v258_v15, %v232_v1  ;;  %s230_s28 = scalar_lea.vmem [#allocation9], %s450_s29  ;;  %p969_p12 = scmp.ne.s32.totalorder %s962_s23, 0 }
  0x68   : > { %v256_v14 = vmul.f32 %v255_v13, %v231_v0  ;;  %v263_v19 = vmul.f32 %v262_v16, %v233_v2  ;;  %v266_v20 = vstv %s437_s18  ;;  %v275_v23 = vstv %s440_s22  ;;  %s309_s27 = sshll.u32 %s230_s28, 4  ;;  %s903_s11 = scalar_lea.hbm %s955_s3, %s451_s9  ;;  %s898_s27 = int_to_ptr.vmem [resolvable:$true] %s309_s27 }
  0x69   : > { %v245_v17 = vadd.f32 %v244_v10, %v241_v11  ;;  %v267_v22 = vmul.f32 %v266_v20, %v234_v4  ;;  %v278_v24 = vstv %s441_s19  ;;  %v276_v27 = vmul.f32 %v275_v23, %v231_v0  ;;  %s597_s4 = scalar_lea.vmem %s898_s27, 96  ;;  %s694_s15 = smov [#allocation9]  }
  0x6a   : > { %v260_v26 = vadd.f32 %v259_v18, %v256_v14  ;;  %v279_v28 = vmul.f32 %v278_v24, %v232_v1  ;;  %v282_v29 = vstv %s442_s6  ;;  %v286_v30 = vstv %s886_s7  ;;  %p598_p4 = scmp.ne.s32.totalorder %s898_s27, %s597_s4  ;;  %s601_s18 = sshll.u32 %s694_s15, 4  ;;  %s602_s18 = int_to_ptr.vmem [resolvable:$false] %s601_s18 }
  0x6b   : > { %v249_v25 = vadd.f32 %v248_v12, %v245_v17  ;;  %v283_v34 = vmul.f32 %v282_v29, %v233_v2  ;;  %v270_v35 = vstv %s888_s25  ;;  %v287_v36 = vmul.f32 %v286_v30, %v234_v4  ;;  %s603_s22 = scalar_lea.vmem %s602_s18, 192  ;;  %p604_p10 = scmp.lt.s32.totalorder %s898_s27, %s602_s18 }
  0x6c   : > { %v264_v32 = vadd.f32 %v263_v19, %v260_v26  ;;  %v280_v33 = vadd.f32 %v279_v28, %v276_v27  ;;  %v290_v39 = vstv %s891_s30  ;;  %p599_p0 = pnand %p598_p4, %p969_p12  ;;  %p605_p11 = scmp.lt.s32.totalorder %s603_s22, %s597_s4 }
  0x6d   : > { %v252_v31 = vadd.f32 %v251_v21, %v249_v25 }
  0x6e   : > { %v268_v37 = vadd.f32 %v267_v22, %v264_v32  ;;  %v284_v38 = vadd.f32 %v283_v34, %v280_v33  ;;  %p600_p5 = pneg %p599_p0  ;;  %p606_p3 = por %p605_p11, %p604_p10 }
  0x6f   : > { %253 = vst [vmem:[%s230_s28] sm:$0x3] %v252_v31 }
  0x70   : > { %v271_v40 = vadd.f32 %v270_v35, %v268_v37  ;;  %v288_v41 = vadd.f32 %v287_v36, %v284_v38  ;;  %p607_p7 = pnand %p606_p3, %p600_p5 }
  0x72   : > { %439 = vst [vmem:[%s230_s28 + $0x2] sm:$0x3] %v271_v40  ;;  %v291_v42 = vadd.f32 %v290_v39, %v288_v41 }
  0x74   : > { %445 = vst [vmem:[%s230_s28 + $0x4] sm:$0x3] %v291_v42 }
  0x75   : > { %610 = shalt.err (!%p607_p7)
}
  0x76   : > { %s611_s19 = scalar_lea.hbm %s903_s11, 96  ;;  %s615_s25 = scalar_lea.hbm %s955_s3, 192 }
  0x77   : > { %p612_p9 = scmp.ne.s32.totalorder %s903_s11, %s611_s19  ;;  %p616_p1 = scmp.lt.u32.totalorder %s903_s11, %s955_s3 }
  0x78   : > { %p617_p8 = scmp.lt.u32.totalorder %s615_s25, %s611_s19  ;;  %p619_p4 = scmp.lt.u32.totalorder %s611_s19, %s903_s11 }
  0x79   : > { %p613_p2 = pnand %p612_p9, %p969_p12 }
  0x7a   : > { %p618_p13 = por %p617_p8, %p616_p1 }
  0x7b   : > { %p614_p6 = pneg %p613_p2 }
  0x7c   : > { %p620_p0 = por %p619_p4, %p618_p13 }
  0x7e   : > { %p621_p5 = pnand %p620_p0, %p614_p6 }
  0x80   : > { %624 = shalt.err (!%p621_p5)
}
  0x81   : > { %s695_s28 = smov 32   ;;  %s696_s9 = smov 2  }
  0x82   : > { %462 = dma.vmem_to_hbm [thread:$0]  (%p969_p12), %s898_s27, 96, %s903_s11, %s295_s20, %s695_s28, %s695_s28, %s696_s9  }
  0x83 PF: > { %s324_s21 = sand.u32 1, %s667_s12   ;;  %p970_p10 = scmp.ne.s32.totalorder %s963_s24, 0 }
  0x84   : > { %p971_p11 = scmp.ge.s32.totalorder %s687_s17, 2  ;;  %s325_s10 = scalar_lea.sflag [#allocation4], %s324_s21 }
  0x86   : > { %p476_p3 = pnand %p971_p11, %p970_p10 }
  0x88   : > { %662 = dma.done.wait (!%p476_p3), %s325_s10, 96  }
  0x89   : > { %664 = vsyncadd (!%p476_p3), %s325_s10, 4294967200  ;;  %s21_s17 = sadd.s32 1, %s687_s17   ;;  %s972_s12 = smov %s671_s13 }
  0x8a   : > { %p18_p7 = scmp.ge.s32.totalorder %s21_s17, 4   ;;  %s973_s13 = smov %s675_s14 }
  0x8b   : > { %s974_s14 = smov %s833_s26  ;;  %s975_s15 = smov %s683_s16 }
  0x8c   : > { %s976_s16 = smov %s978_s5  ;;  %20 = sbr.rel (!%p18_p7) target bundleno = 8 (0x8), region = 89 }
  0x93   :  { %330 = vsyncpa [#allocation3], 1 }
  0x94   :  { %332 = vsyncpa [#allocation3 + $0x1], 1 }
  0x95   :  { %333 = vsyncpa [#allocation4], 1 }
  0x96   :  { %335 = vsyncpa [#allocation4 + $0x1], 1 }
  0x97   :  { %336 = vsyncpa [#allocation5], 1 }
  0x98   :  { %338 = vsyncpa [#allocation5 + $0x1], 1 }
  0x99   :  { %339 = vsyncpa [#allocation6], 1 }
  0x9a   :  { %341 = vsyncpa [#allocation6 + $0x1], 1 }

</bundles_post_ra>
